<compile_context>
chip_gen: v5e
topology: v5e:2x2
jax: 0.10.0
libtpu: 0.0.40
codegen_flags: <defaults>
</compile_context>

<pallas_src>
import jax
import jax.numpy as jnp
from jax.experimental import pallas as pl
from jax.experimental.pallas import tpu as pltpu

KH = KW = 3
STRIDE = 2
PAD = 1
EPS = 1e-5  # nn.BatchNorm2d default eps

_GROUPS = ((0, 0), (0, 1), (1, 0), (1, 1))  # (dh, dw) tap groups for stride 2
_VMEM_LIMIT = 40 * 1024 * 1024              # < v7x 64 MiB physical, with headroom
_TM_MAX = 512                               # rows per conv/BN tile (perf review)


def _conv_stats_kernel(xp_ref, w_ref, y_ref, s_ref):
    """One (TM, Kp) x (Kp, coutp) MXU matmul per tile + fused BN statistics."""
    acc = jnp.dot(xp_ref[0], w_ref[...], preferred_element_type=jnp.float32)
    y_ref[0] = acc.astype(y_ref.dtype)                      # bf16 intermediate
    # BN statistics ride the XLU/VPU slots while the tile is MXU/DMA-bound.
    # TODO(synk): switch to centered/shifted accumulation if E[x^2]-mean^2
    # cancellation ever matters for activations with mean >> std.
    s_ref[0, 0, 0:1, :] = jnp.sum(acc, axis=0, keepdims=True)
    s_ref[0, 0, 1:2, :] = jnp.sum(acc * acc, axis=0, keepdims=True)


def _bn_relu_kernel(y_ref, scale_ref, shift_ref, o_ref):
    """relu(y*scale + shift); emitted channel-major (coutp, TM) in out dtype."""
    y = y_ref[0].astype(jnp.float32)                        # f32 BN math (v5e)
    z = jnp.maximum(y * scale_ref[...] + shift_ref[...], 0.0)
    o_ref[0] = jnp.transpose(z).astype(o_ref.dtype)         # fold NCHW transpose


def vgg_block_forward(x_nchw, w_hwio, bias, gamma, beta, *,
                      compute_dtype=jnp.bfloat16):
    # conv bias cancels exactly under training-mode BatchNorm (y - mean);
    # it is intentionally unused (matches the module's forward output).
    del bias
    n, cin, h, w = x_nchw.shape
    cout = w_hwio.shape[-1]
    out_dtype = x_nchw.dtype
    ho = (h + 2 * PAD - KH) // STRIDE + 1
    wo = (w + 2 * PAD - KW) // STRIDE + 1
    hp, wp = 2 * (ho + 1), 2 * (wo + 1)            # even padded extents
    k16 = 16 * cin
    kp = max(128, ((k16 + 127) // 128) * 128)      # lane-dense K
    coutp = max(128, ((cout + 127) // 128) * 128)  # lane-dense output channels

    rows = ho * wo
    tm = rows if rows <= _TM_MAX else _TM_MAX
    m_tiles = pl.cdiv(rows, tm)
    rows_pad = m_tiles * tm                        # zero rows: inert for stats

    # ---- layout glue (one XLA packing pass, in compute dtype): space-to-depth
    # + the 4 stride-2 tap groups concatenated along K -> (rows, 16*cin).
    x = jnp.transpose(x_nchw, (0, 2, 3, 1)).astype(compute_dtype)       # NHWC
    xq = jnp.pad(x, ((0, 0), (PAD, hp - h - PAD), (PAD, wp - w - PAD), (0, 0)))
    xq = xq.reshape(n, ho + 1, 2, wo + 1, 2, cin)
    xq = jnp.transpose(xq, (0, 1, 3, 2, 4, 5)).reshape(n, ho + 1, wo + 1,
                                                       4 * cin)
    patches = jnp.concatenate(
        [xq[:, dh:dh + ho, dw:dw + wo, :] for dh, dw in _GROUPS], axis=-1)
    patches = patches.reshape(n, rows, k16)
    patches = jnp.pad(patches, ((0, 0), (0, rows_pad - rows), (0, kp - k16)))

    # ---- weights: single (Kp, coutp) matrix matching the patch K layout;
    # taps with kh==3 or kw==3 and the padded K/cout entries are zero (inert).
    wq = jnp.pad(w_hwio.astype(jnp.float32),
                 ((0, 1), (0, 1), (0, 0), (0, coutp - cout)))
    wq = wq.reshape(2, 2, 2, 2, cin, coutp)            # (dh, a, dw, b, cin, co)
    wq = jnp.transpose(wq, (0, 2, 1, 3, 4, 5)).reshape(k16, coutp)
    wq = jnp.pad(wq, ((0, kp - k16), (0, 0))).astype(compute_dtype)

    conv, stats = pl.pallas_call(
        _conv_stats_kernel,
        out_shape=(jax.ShapeDtypeStruct((n, rows_pad, coutp), compute_dtype),
                   jax.ShapeDtypeStruct((n, m_tiles, 2, coutp), jnp.float32)),
        grid=(n, m_tiles),
        in_specs=[
            pl.BlockSpec((1, tm, kp), lambda b, m: (b, m, 0)),
            # grid-invariant weights: do not double-buffer them in VMEM
            pl.BlockSpec((kp, coutp), lambda b, m: (0, 0),
                         pipeline_mode=pl.Buffered(1)),
        ],
        out_specs=(pl.BlockSpec((1, tm, coutp), lambda b, m: (b, m, 0)),
                   pl.BlockSpec((1, 1, 2, coutp), lambda b, m: (b, m, 0, 0))),
        compiler_params=pltpu.CompilerParams(
            dimension_semantics=("parallel", "parallel"),
            vmem_limit_bytes=_VMEM_LIMIT),
    )(patches, wq)

    # ---- tiny (n, m_tiles, 2, coutp) stat reduction + affine folding in XLA
    cnt = jnp.float32(n * rows)                    # padded rows contribute 0
    ssum = jnp.sum(stats, axis=(0, 1))             # (2, coutp)
    mean = ssum[0] / cnt
    var = jnp.maximum(ssum[1] / cnt - mean * mean, 0.0)
    gamma_p = jnp.pad(gamma.astype(jnp.float32), (0, coutp - cout))
    beta_p = jnp.pad(beta.astype(jnp.float32), (0, coutp - cout))
    scale = gamma_p * jax.lax.rsqrt(var + EPS)     # zero on padded channels
    shift = beta_p - mean * scale

    # ---- row-tiled normalize + ReLU; emit channel-major blocks so the NCHW
    # conversion below is a cheap slice + free reshape (no transpose pass).
    out_cm = pl.pallas_call(
        _bn_relu_kernel,
        out_shape=jax.ShapeDtypeStruct((n, coutp, rows_pad), out_dtype),
        grid=(n, m_tiles),
        in_specs=[pl.BlockSpec((1, tm, coutp), lambda b, m: (b, m, 0)),
                  pl.BlockSpec((1, coutp), lambda b, m: (0, 0)),
                  pl.BlockSpec((1, coutp), lambda b, m: (0, 0))],
        out_specs=pl.BlockSpec((1, coutp, tm), lambda b, m: (b, 0, m)),
        compiler_params=pltpu.CompilerParams(
            dimension_semantics=("parallel", "parallel"),
            vmem_limit_bytes=_VMEM_LIMIT),
    )(conv, scale.reshape(1, coutp), shift.reshape(1, coutp))

    # Slice is a no-op when cout % 128 == 0 and rows % tm == 0.
    # TODO(synk): fp8 inputs/weights with per-channel scales for deep layers on
    # v7x; emit NHWC directly if the downstream consumer accepts it.
    out = out_cm[:, :cout, :rows].reshape(n, cout, ho, wo)
    return out                                      # NCHW, dtype == x dtype


def _reference(x_nchw, w_hwio, bias, gamma, beta):
    x = jnp.transpose(x_nchw, (0, 2, 3, 1))
    y = jax.lax.conv_general_dilated(
        x, w_hwio, window_strides=(STRIDE, STRIDE),
        padding=((PAD, PAD), (PAD, PAD)),
        dimension_numbers=("NHWC", "HWIO", "NHWC")) + bias
    mean = jnp.mean(y, axis=(0, 1, 2), keepdims=True)
    var = jnp.mean((y - mean) ** 2, axis=(0, 1, 2), keepdims=True)
    yn = (y - mean) * jax.lax.rsqrt(var + EPS) * gamma + beta
    return jnp.transpose(jnp.maximum(yn, 0.0), (0, 3, 1, 2))


if __name__ == "__main__":
    key = jax.random.PRNGKey(0)
    k1, k2, k3, k4, k5 = jax.random.split(key, 5)
    N, CIN, H, W, COUT = 2, 4, 16, 16, 8

    x = jax.random.normal(k1, (N, CIN, H, W), jnp.float32)
    w = 0.1 * jax.random.normal(k2, (KH, KW, CIN, COUT), jnp.float32)   # HWIO
    b = 0.1 * jax.random.normal(k3, (COUT,), jnp.float32)
    gamma = 1.0 + 0.1 * jax.random.normal(k4, (COUT,), jnp.float32)
    beta = 0.1 * jax.random.normal(k5, (COUT,), jnp.float32)

    ref = _reference(x, w, b, gamma, beta)

    # f32 path: tight check of the restructured conv / stats / BN math.
    out32 = jax.block_until_ready(
        vgg_block_forward(x, w, b, gamma, beta, compute_dtype=jnp.float32))
    assert out32.shape == (N, COUT, H // 2, W // 2), out32.shape
    assert jnp.allclose(out32, ref, atol=2e-4, rtol=2e-4), float(
        jnp.max(jnp.abs(out32 - ref)))

    # default bf16 storage/compute path (f32 accumulation + f32 BN math).
    out16 = jax.block_until_ready(vgg_block_forward(x, w, b, gamma, beta))
    assert out16.shape == (N, COUT, H // 2, W // 2), out16.shape
    assert jnp.allclose(out16, ref, atol=7.5e-2, rtol=7.5e-2), float(
        jnp.max(jnp.abs(out16 - ref)))

    print("KERNEL_OK")
</pallas_src>

<mosaic_0001>
module attributes {stable_mosaic.version = 11 : i64} {
  func.func @_conv_stats_kernel(%arg0: i32, %arg1: i32, %arg2: memref<1x64x128xf32, #tpu.memory_space<vmem>>, %arg3: memref<128x128xf32, #tpu.memory_space<vmem>>, %arg4: memref<1x64x128xf32, #tpu.memory_space<vmem>>, %arg5: memref<1x1x2x128xf32, #tpu.memory_space<vmem>>) attributes {dimension_semantics = [#tpu.dimension_semantics<parallel>, #tpu.dimension_semantics<parallel>], iteration_bounds = array<i64: 2, 1>, scalar_prefetch = 0 : i64, scratch_operands = 0 : i64, tpu.core_type = #tpu.core_type<tc>, window_params = [{transform_indices = @transform_0, window_bounds = array<i64: 1, 64, 128>}, {pipeline_mode = #tpu.pipeline_mode<synchronous>, transform_indices = @transform_1, window_bounds = array<i64: 128, 128>}, {transform_indices = @transform_2, window_bounds = array<i64: 1, 64, 128>}, {transform_indices = @transform_3, window_bounds = array<i64: 1, 1, 2, 128>}]} {
    %c0 = arith.constant 0 : index
    %c0_0 = arith.constant 0 : index
    %c0_1 = arith.constant 0 : index
    %0 = vector.load %arg2[%c0, %c0_0, %c0_1] : memref<1x64x128xf32, #tpu.memory_space<vmem>>, vector<1x64x128xf32>
    %1 = vector.shape_cast %0 : vector<1x64x128xf32> to vector<64x128xf32>
    %c0_2 = arith.constant 0 : index
    %c0_3 = arith.constant 0 : index
    %2 = vector.load %arg3[%c0_2, %c0_3] : memref<128x128xf32, #tpu.memory_space<vmem>>, vector<128x128xf32>
    %cst = arith.constant dense<0.000000e+00> : vector<64x128xf32>
    %3 = tpu.matmul %1, %2, %cst {dimension_numbers = #tpu.dot_dimension_numbers<[1], [0], [0], [1], [0, 0, 1, 1], [], []>} : vector<64x128xf32>, vector<128x128xf32>, vector<64x128xf32> -> vector<64x128xf32>
    %c0_4 = arith.constant 0 : index
    %c0_5 = arith.constant 0 : index
    %c0_6 = arith.constant 0 : index
    %4 = vector.load %arg4[%c0_4, %c0_5, %c0_6] : memref<1x64x128xf32, #tpu.memory_space<vmem>>, vector<1x64x128xf32>
    %5 = vector.shape_cast %4 : vector<1x64x128xf32> to vector<64x128xf32>
    %6 = vector.shape_cast %3 : vector<64x128xf32> to vector<1x64x128xf32>
    tpu.vector_store %arg4[%c0_4, %c0_5, %c0_6], %6 {strides = array<i32>} : memref<1x64x128xf32, #tpu.memory_space<vmem>>, vector<1x64x128xf32>,
    %cst_7 = arith.constant dense<0.000000e+00> : vector<128xf32>
    %7 = vector.multi_reduction <add>, %3, %cst_7 [0] : vector<64x128xf32> to vector<128xf32>
    %8 = vector.shape_cast %7 : vector<128xf32> to vector<1x128xf32>
    %c0_8 = arith.constant 0 : index
    %c0_9 = arith.constant 0 : index
    %c0_10 = arith.constant 0 : index
    %c0_11 = arith.constant 0 : index
    %9 = vector.load %arg5[%c0_8, %c0_9, %c0_10, %c0_11] : memref<1x1x2x128xf32, #tpu.memory_space<vmem>>, vector<1x1x1x128xf32>
    %10 = vector.shape_cast %9 : vector<1x1x1x128xf32> to vector<1x128xf32>
    %11 = vector.shape_cast %8 : vector<1x128xf32> to vector<1x1x1x128xf32>
    tpu.vector_store %arg5[%c0_8, %c0_9, %c0_10, %c0_11], %11 {strides = array<i32>} : memref<1x1x2x128xf32, #tpu.memory_space<vmem>>, vector<1x1x1x128xf32>,
    %12 = arith.mulf %3, %3 : vector<64x128xf32>
    %cst_12 = arith.constant dense<0.000000e+00> : vector<128xf32>
    %13 = vector.multi_reduction <add>, %12, %cst_12 [0] : vector<64x128xf32> to vector<128xf32>
    %14 = vector.shape_cast %13 : vector<128xf32> to vector<1x128xf32>
    %c0_13 = arith.constant 0 : index
    %c0_14 = arith.constant 0 : index
    %c1 = arith.constant 1 : index
    %c0_15 = arith.constant 0 : index
    %15 = vector.load %arg5[%c0_13, %c0_14, %c1, %c0_15] : memref<1x1x2x128xf32, #tpu.memory_space<vmem>>, vector<1x1x1x128xf32>
    %16 = vector.shape_cast %15 : vector<1x1x1x128xf32> to vector<1x128xf32>
    %17 = vector.shape_cast %14 : vector<1x128xf32> to vector<1x1x1x128xf32>
    tpu.vector_store %arg5[%c0_13, %c0_14, %c1, %c0_15], %17 {strides = array<i32>} : memref<1x1x2x128xf32, #tpu.memory_space<vmem>>, vector<1x1x1x128xf32>,
    return
  }
  func.func @transform_0(%arg0: i32, %arg1: i32) -> (i32, i32, i32) {
    %c0_i32 = arith.constant 0 : i32
    %c0_i32_0 = arith.constant 0 : i32
    return %arg0, %arg1, %c0_i32 : i32, i32, i32
  }
  func.func @transform_1(%arg0: i32, %arg1: i32) -> (i32, i32) {
    %c0_i32 = arith.constant 0 : i32
    %c0_i32_0 = arith.constant 0 : i32
    %c0_i32_1 = arith.constant 0 : i32
    return %c0_i32, %c0_i32_0 : i32, i32
  }
  func.func @transform_2(%arg0: i32, %arg1: i32) -> (i32, i32, i32) {
    %c0_i32 = arith.constant 0 : i32
    %c0_i32_0 = arith.constant 0 : i32
    return %arg0, %arg1, %c0_i32 : i32, i32, i32
  }
  func.func @transform_3(%arg0: i32, %arg1: i32) -> (i32, i32, i32, i32) {
    %c0_i32 = arith.constant 0 : i32
    %c0_i32_0 = arith.constant 0 : i32
    %c0_i32_1 = arith.constant 0 : i32
    return %arg0, %arg1, %c0_i32, %c0_i32_0 : i32, i32, i32, i32
  }
}

</mosaic_0001>

<bundles_post_ra>
// kernel: tpu_custom_call.1
= control target key start
LH: loop header
LB: loop body
LE: loop exit
PB: predicated region body
PF: predicated region fallthrough
CT: control target
= control target key end

     0   :  { %s1075_s0 = inlined_call_operand.hbm [shape: f32[2,64,128], index: 0, kind: input, shape index: {}]   ;;  %s1076_s1 = inlined_call_operand.hbm [shape: f32[128,128], index: 1, kind: input, shape index: {}]   ;;  %s1077_s2 = inlined_call_operand.hbm [shape: f32[2,64,128], index: 2, kind: output, shape index: {0}]   ;;  %s1078_s3 = inlined_call_operand.hbm [shape: f32[2,1,2,128], index: 3, kind: output, shape index: {1}]  }
   0x1   :  { %1080 = sst [smem:[#allocation14_spill]] %s1076_s1 }
   0x2   :  { %9 = vsyncpa [#allocation3], 0 }
   0x3   :  { %11 = vsyncpa [#allocation3 + $0x1], 0 }
   0x4   :  { %12 = vsyncpa [#allocation6], 0 }
   0x5   :  { %13 = vsyncpa [#allocation4], 0 }
   0x6   :  { %15 = vsyncpa [#allocation4 + $0x1], 0 }
   0x7   :  { %16 = vsyncpa [#allocation9], 0 }
   0x8   :  { %18 = vsyncpa [#allocation9 + $0x1], 0  ;;  %s876_s12 = smov 0   ;;  %s878_s13 = smov 0  }
   0x9   :  { %s880_s14 = smov 0   ;;  %s882_s15 = smov 0  }
   0xa   :  { %s884_s16 = smov 0   ;;  %s886_s17 = smov 0  }
   0xb LB: > { %s519_s18 = sadd.s32 4294967295, %s849_s17   ;;  %s520_s19 = sadd.s32 4294967294, %s849_s17   ;;  %s849_s17 = sphi %s886_s17, %s24_s17   ;;  %s845_s16 = sphi %s884_s16, %s1094_s16   ;;  %s841_s15 = sphi %s882_s15, %s1093_s15   ;;  %s837_s14 = sphi %s880_s14, %s1092_s14   ;;  %s833_s13 = sphi %s878_s13, %s1091_s13   ;;  %s829_s12 = sphi %s876_s12, %s1090_s12  }
   0xc   : > { %p58_p0 = scmp.ne.s32.totalorder %s833_s13, %s829_s12  ;;  %p910_p1 = scmp.eq.s32.totalorder %s519_s18, 0 }
   0xd   : > { %p914_p2 = scmp.eq.s32.totalorder %s519_s18, 1  ;;  %p111_p3 = scmp.eq.s32.totalorder %s520_s19, 1 }
   0xe   : > { %p920_p4 = por %p910_p1, %p58_p0  ;;  %p521_p5 = scmp.ge.s32.totalorder %s849_s17, 1 }
   0xf   : > { %p925_p6 = por %p111_p3, %p58_p0  ;;  %p146_p7 = scmp.lt.s32.totalorder %s849_s17, 3 }
  0x10   : > { %s1085_s1 = sld [smem:[#allocation14_spill]]  ;;  %s851_s28 = smov [#allocation5]  }
  0x11   : > { %p933_p8 = pnand %p521_p5, %p146_p7  ;;  %s159_s29 = sshll.u32 %s851_s28, 4  ;;  %s160_s29 = int_to_ptr.vmem [resolvable:$true] %s159_s29 }
  0x12   : > { %p523_p11 = scmp.ge.s32.totalorder %s849_s17, 2  ;;  %s1079_s30 = smov 128  }
  0x13   : > { %p599_p9 = pneg %p933_p8  ;;  %s853_s4 = smov 8  }
  0x14   : > { %s36_s5 = sadd.s32 1, %s845_s16  ;;  %s45_s6 = sadd.s32 1, %s837_s14 }
  0x15   : > { %p600_p10 = pnand %p599_p9, %p910_p1  ;;  %p38_p12 = scmp.ge.s32.totalorder %s36_s5, 2 }
  0x16   : > { %s157_s26 = sshll.u32 %s1085_s1, 4  ;;  %p52_p13 = scmp.ne.s32.totalorder %s837_s14, %s833_s13  ;;  %s158_s26 = int_to_ptr.hbm [resolvable:$true] %s157_s26 }
  0x17   : > { %602 = dma.hbm_to_vmem [thread:$0]  (!%p600_p10), %s158_s26, 2048, %s160_s29, [#allocation6], %s1079_s30, %s1079_s30, %s853_s4  }
  0x18   : > { %p53_p0 = scmp.eq.s32.totalorder %s849_s17, 0  ;;  %s1096_s5 = smov (%p38_p12, %s36_s5), 0 }
  0x19   : > { %p958_p5 = por %p914_p2, %p52_p13  ;;  %s40_s9 = ssub.s32 %s845_s16, %s1096_s5 }
  0x1a   : > { %p952_p3 = por %p53_p0, %p52_p13  ;;  %p615_p7 = scmp.lt.s32.totalorder %s849_s17, 2 }
  0x1b   : > { %p43_p9 = scmp.eq.s32.totalorder %s40_s9, 0  ;;  %s173_s10 = sand.u32 1, %s837_s14  }
  0x1c   : > { %s524_s11 = sshll.u32 %s173_s10, 6  ;;  %s539_s19 = sshll.u32 %s845_s16, 6 }
  0x1d   : > { %s967_s18 = scalar_select %p43_p9, %s837_s14, %s45_s6  }
  0x1e   : > { %s184_s26 = scalar_lea.hbm %s1075_s0, %s539_s19  ;;  %s177_s28 = scalar_lea.vmem [#allocation2], %s524_s11 }
  0x1f   : > { %s187_s29 = sshll.u32 %s177_s28, 4  ;;  %s185_s21 = sshll.u32 %s184_s26, 4  ;;  %s188_s29 = int_to_ptr.vmem [resolvable:$true] %s187_s29  ;;  %s186_s21 = int_to_ptr.hbm [resolvable:$true] %s185_s21 }
  0x20   : > { %p604_p2 = pnand %p615_p7, %p952_p3  ;;  %s174_s30 = scalar_lea.sflag [#allocation3], %s173_s10 }
  0x21   : > { %s1089_s1 = smov 128   ;;  %199 = sbr.rel (%p933_p8) target bundleno = 238 (0xee), region = 28 }
  0x22   : > { %606 = dma.hbm_to_vmem [thread:$0]  (!%p604_p2), %s186_s21, 1024, %s188_s29, %s174_s30, %s1089_s1, %s1089_s1, %s853_s4  }
  0x23   : > { %s981_s6 = sand.u32 (!%p933_p8), 1, %s833_s13  }
  0x24   : > { %s528_s9 = sshll.u32 (!%p933_p8), %s981_s6, 6  ;;  %s202_s11 = scalar_lea.sflag (!%p933_p8), [#allocation3], %s981_s6 }
  0x25   : > { %s987_s7 = scalar_lea.vmem (!%p933_p8), [#allocation2], %s528_s9 }
  0x26   : > { %812 = dma.done.wait (%p920_p4), %s202_s11, 1024  }
  0x27   : > { %814 = vsyncadd (%p920_p4), %s202_s11, 4294966272 }
  0x28   : > { %816 = dma.done.wait (%p910_p1), [#allocation6], 2048  }
  0x29   : > { %818 = vsyncadd (%p910_p1), [#allocation6], 4294965248  ;;  %v264_v0 = vld [vmem:[#allocation5 + $0x78] sm:$0xff]  ;;  %v263_v1 = vld [vmem:[#allocation5 + $0x70] sm:$0xff]  ;;  %s1007_s1 = scalar_lea.vmem [#allocation7], %s528_s9  ;;  %s540_s20 = sshll.u32 %s841_s15, 6 }
  0x2a   : > { %265 = vmatpush.msra.mxu0 %v264_v0  ;;  %542 = vmatpush.msra.mxu2 %v264_v0  ;;  %v262_v2 = vld [vmem:[#allocation5 + $0x68] sm:$0xff]  ;;  %v261_v3 = vld [vmem:[#allocation5 + $0x60] sm:$0xff]  ;;  %v260_v4 = vld [vmem:[#allocation5 + $0x58] sm:$0xff]  ;;  %s369_s30 = scalar_lea.hbm %s1077_s2, %s540_s20  ;;  %s370_s4 = sshll.u32 %s1007_s1, 4  ;;  %s1020_s4 = int_to_ptr.vmem [resolvable:$true] %s370_s4 }
  0x2b   : > { %541 = vmatpush.msra.mxu1 %v264_v0  ;;  %543 = vmatpush.msra.mxu3 %v264_v0  ;;  %v259_v5 = vld [vmem:[#allocation5 + $0x50] sm:$0xff]  ;;  %v258_v6 = vld [vmem:[#allocation5 + $0x48] sm:$0xff]  ;;  %v257_v7 = vld [vmem:[#allocation5 + $0x40] sm:$0xff]  ;;  %s372_s10 = sshll.u32 %s369_s30, 4  ;;  %s351_s19 = scalar_lea.sflag [#allocation4], %s981_s6  ;;  %s373_s10 = int_to_ptr.hbm [resolvable:$true] %s372_s10 }
  0x2c   : > { %266 = vmatpush.msra.mxu0 %v263_v1  ;;  %545 = vmatpush.msra.mxu2 %v263_v1  ;;  %v256_v8 = vld [vmem:[#allocation5 + $0x38] sm:$0xff]  ;;  %v255_v9 = vld [vmem:[#allocation5 + $0x30] sm:$0xff]  ;;  %v254_v10 = vld [vmem:[#allocation5 + $0x28] sm:$0xff]  ;;  %s745_s24 = sshra.s32 %s373_s10, 4  ;;  %s751_s29 = scalar_lea.hbm %s1077_s2, 128  ;;  %s746_s24 = int_to_ptr.hbm [resolvable:$true] %s745_s24 }
  0x2d   : > { %544 = vmatpush.msra.mxu1 %v263_v1  ;;  %546 = vmatpush.msra.mxu3 %v263_v1  ;;  %v253_v11 = vld [vmem:[#allocation5 + $0x20] sm:$0xff]  ;;  %v252_v12 = vld [vmem:[#allocation5 + $0x18] sm:$0xff]  ;;  %v251_v13 = vld [vmem:[#allocation5 + $0x10] sm:$0xff]  ;;  %s747_s25 = scalar_lea.hbm %s746_s24, 64  ;;  %p752_p10 = scmp.lt.s32.totalorder %s746_s24, %s1077_s2 }
  0x2e   : > { %267 = vmatpush.msra.mxu0 %v262_v2  ;;  %548 = vmatpush.msra.mxu2 %v262_v2  ;;  %v250_v14 = vld [vmem:[#allocation5 + $0x8] sm:$0xff]  ;;  %v249_v15 = vld [vmem:[#allocation5] sm:$0xff]  ;;  %v243_v18 = vld [vmem:[%s987_s7 + $0x10] sm:$0xff]  ;;  %p748_p1 = scmp.ne.s32.totalorder %s746_s24, %s747_s25  ;;  %p753_p12 = scmp.lt.s32.totalorder %s751_s29, %s747_s25 }
  0x2f   : > { %547 = vmatpush.msra.mxu1 %v262_v2  ;;  %549 = vmatpush.msra.mxu3 %v262_v2  ;;  %v241_v16 = vld [vmem:[%s987_s7] sm:$0xff]  ;;  %v247_v19 = vld [vmem:[%s987_s7 + $0x30] sm:$0xff]  ;;  %v242_v20 = vld [vmem:[%s987_s7 + $0x8] sm:$0xff] }
  0x30   : > { %268 = vmatpush.msra.mxu0 %v261_v3  ;;  %551 = vmatpush.msra.mxu2 %v261_v3  ;;  %v245_v17 = vld [vmem:[%s987_s7 + $0x20] sm:$0xff]  ;;  %v246_v21 = vld [vmem:[%s987_s7 + $0x28] sm:$0xff]  ;;  %v244_v22 = vld [vmem:[%s987_s7 + $0x18] sm:$0xff]  ;;  %p749_p4 = pnand %p748_p1, %p958_p5  ;;  %p754_p13 = por %p753_p12, %p752_p10 }
  0x31   : > { %550 = vmatpush.msra.mxu1 %v261_v3  ;;  %552 = vmatpush.msra.mxu3 %v261_v3  ;;  %v248_v23 = vld [vmem:[%s987_s7 + $0x38] sm:$0xff] }
  0x32   : > { %269 = vmatpush.msra.mxu0 %v260_v4  ;;  %554 = vmatpush.msra.mxu2 %v260_v4  ;;  %p750_p8 = pneg %p749_p4 }
  0x33   : > { %553 = vmatpush.msra.mxu1 %v260_v4  ;;  %555 = vmatpush.msra.mxu3 %v260_v4 }
  0x34   : > { %270 = vmatpush.msra.mxu0 %v259_v5  ;;  %557 = vmatpush.msra.mxu2 %v259_v5  ;;  %p755_p0 = pnand %p754_p13, %p750_p8 }
  0x35   : > { %556 = vmatpush.msra.mxu1 %v259_v5  ;;  %558 = vmatpush.msra.mxu3 %v259_v5 }
  0x36   : > { %271 = vmatpush.msra.mxu0 %v258_v6  ;;  %560 = vmatpush.msra.mxu2 %v258_v6 }
  0x37   : > { %559 = vmatpush.msra.mxu1 %v258_v6  ;;  %561 = vmatpush.msra.mxu3 %v258_v6 }
  0x38   : > { %272 = vmatpush.msra.mxu0 %v257_v7  ;;  %563 = vmatpush.msra.mxu2 %v257_v7 }
  0x39   : > { %562 = vmatpush.msra.mxu1 %v257_v7  ;;  %564 = vmatpush.msra.mxu3 %v257_v7 }
  0x3a   : > { %273 = vmatpush.msra.mxu0 %v256_v8  ;;  %566 = vmatpush.msra.mxu2 %v256_v8 }
  0x3b   : > { %565 = vmatpush.msra.mxu1 %v256_v8  ;;  %567 = vmatpush.msra.mxu3 %v256_v8 }
  0x3c   : > { %274 = vmatpush.msra.mxu0 %v255_v9  ;;  %569 = vmatpush.msra.mxu2 %v255_v9 }
  0x3d   : > { %568 = vmatpush.msra.mxu1 %v255_v9  ;;  %570 = vmatpush.msra.mxu3 %v255_v9 }
  0x3e   : > { %275 = vmatpush.msra.mxu0 %v254_v10  ;;  %572 = vmatpush.msra.mxu2 %v254_v10 }
  0x3f   : > { %571 = vmatpush.msra.mxu1 %v254_v10  ;;  %573 = vmatpush.msra.mxu3 %v254_v10 }
  0x40   : > { %276 = vmatpush.msra.mxu0 %v253_v11  ;;  %575 = vmatpush.msra.mxu2 %v253_v11 }
  0x41   : > { %574 = vmatpush.msra.mxu1 %v253_v11  ;;  %576 = vmatpush.msra.mxu3 %v253_v11 }
  0x42   : > { %277 = vmatpush.msra.mxu0 %v252_v12  ;;  %578 = vmatpush.msra.mxu2 %v252_v12 }
  0x43   : > { %577 = vmatpush.msra.mxu1 %v252_v12  ;;  %579 = vmatpush.msra.mxu3 %v252_v12 }
  0x44   : > { %278 = vmatpush.msra.mxu0 %v251_v13  ;;  %581 = vmatpush.msra.mxu2 %v251_v13 }
  0x45   : > { %580 = vmatpush.msra.mxu1 %v251_v13  ;;  %582 = vmatpush.msra.mxu3 %v251_v13 }
  0x46   : > { %279 = vmatpush.msra.mxu0 %v250_v14  ;;  %584 = vmatpush.msra.mxu2 %v250_v14 }
  0x47   : > { %583 = vmatpush.msra.mxu1 %v250_v14  ;;  %585 = vmatpush.msra.mxu3 %v250_v14 }
  0x48   : > { %280 = vmatpush.msra.mxu0 %v249_v15  ;;  %587 = vmatpush.msra.mxu2 %v249_v15 }
  0x49   : > { %281 = vmatmul.f32.vlgmr.msra.gmra.mxu0 %v241_v16  ;;  %293 = vmatmul.f32.vlgmr.msra.gmra.mxu2 %v245_v17 }
  0x4a   : > { %586 = vmatpush.msra.mxu1 %v249_v15  ;;  %588 = vmatpush.msra.mxu3 %v249_v15 }
  0x4b   : > { %287 = vmatmul.f32.vlgmr.msra.gmra.mxu1 %v243_v18  ;;  %299 = vmatmul.f32.vlgmr.msra.gmra.mxu3 %v247_v19 }
  0x51   : > { %284 = vmatmul.f32.gmra.mxu0 %v242_v20  ;;  %296 = vmatmul.f32.gmra.mxu2 %v246_v21 }
  0x53   : > { %290 = vmatmul.f32.gmra.mxu1 %v244_v22  ;;  %302 = vmatmul.f32.gmra.mxu3 %v248_v23 }
  0xc6   : > { %v282_v24 = vpop.f32.mrf.mxu0 }
  0xc7   : > { %306 = vst [vmem:[%s1007_s1] sm:$0xff] %v282_v24  ;;  %v328_v29 = vmul.f32 %v282_v24, %v282_v24 }
  0xc8   : > { %v288_v25 = vpop.f32.mrf.mxu1 }
  0xc9   : > { %308 = vst [vmem:[%s1007_s1 + $0x10] sm:$0xff] %v288_v25  ;;  %v330_v33 = vmul.f32 %v288_v25, %v288_v25 }
  0xcc   : > { %v294_v26 = vpop.f32.mrf.mxu2 }
  0xcd   : > { %310 = vst [vmem:[%s1007_s1 + $0x20] sm:$0xff] %v294_v26  ;;  %v332_v40 = vmul.f32 %v294_v26, %v294_v26 }
  0xce   : > { %v285_v27 = vpop.f32.mrf.mxu0  ;;  %v300_v28 = vpop.f32.mrf.mxu3 }
  0xcf   : > { %307 = vst [vmem:[%s1007_s1 + $0x8] sm:$0xff] %v285_v27  ;;  %v314_v30 = vadd.f32 %v285_v27, %v282_v24  ;;  %v329_v31 = vmul.f32 %v285_v27, %v285_v27 }
  0xd0   : > { %v291_v32 = vpop.f32.mrf.mxu1  ;;  %312 = vst [vmem:[%s1007_s1 + $0x30] sm:$0xff] %v300_v28 }
  0xd1   : > { %v336_v34 = vadd.f32 %v329_v31, %v328_v29  ;;  %309 = vst [vmem:[%s1007_s1 + $0x18] sm:$0xff] %v291_v32  ;;  %v315_v35 = vadd.f32 %v314_v30, %v288_v25  ;;  %v331_v36 = vmul.f32 %v291_v32, %v291_v32 }
  0xd3   : > { %v316_v37 = vadd.f32 %v315_v35, %v291_v32  ;;  %v337_v38 = vadd.f32 %v336_v34, %v330_v33 }
  0xd4   : > { %v297_v39 = vpop.f32.mrf.mxu2 }
  0xd5   : > { %v338_v41 = vadd.f32 %v337_v38, %v331_v36  ;;  %311 = vst [vmem:[%s1007_s1 + $0x28] sm:$0xff] %v297_v39  ;;  %v317_v42 = vadd.f32 %v316_v37, %v294_v26  ;;  %v333_v43 = vmul.f32 %v297_v39, %v297_v39 }
  0xd6   : > { %v303_v44 = vpop.f32.mrf.mxu3 }
  0xd7   : > { %v318_v45 = vadd.f32 %v317_v42, %v297_v39  ;;  %v339_v46 = vadd.f32 %v338_v41, %v332_v40  ;;  %313 = vst [vmem:[%s1007_s1 + $0x38] sm:$0xff] %v303_v44 }
  0xd8   : > { %758 = shalt.err (!%p755_p0)
}
  0xd9   : > { %s854_s11 = smov 128   ;;  %s855_s7 = smov 8   ;;  %v334_v47 = vmul.f32 %v300_v28, %v300_v28  ;;  %v340_v48 = vadd.f32 %v339_v46, %v333_v43  ;;  %v319_v49 = vadd.f32 %v318_v45, %v300_v28  ;;  %v335_v50 = vmul.f32 %v303_v44, %v303_v44 }
  0xda   : > { %595 = dma.vmem_to_hbm [thread:$0]  (%p958_p5), %s1020_s4, 1024, %s373_s10, %s351_s19, %s854_s11, %s854_s11, %s855_s7  }
  0xdb   : > { %v320_v51 = vadd.f32 %v319_v49, %v303_v44  ;;  %v341_v52 = vadd.f32 %v340_v48, %v334_v47  ;;  %s531_s1 = sshll.u32 %s981_s6, 1  ;;  %s536_s20 = sshll.u32 %s841_s15, 1 }
  0xdc   : > { %s386_s30 = scalar_lea.hbm %s1078_s3, %s536_s20  ;;  %s238_s4 = scalar_lea.vmem [#allocation8], %s531_s1 }
  0xdd   : > { %v321_v53 = vrot.slane %v320_v51, 4  ;;  %v342_v54 = vadd.f32 %v341_v52, %v335_v50  ;;  %s388_s10 = sshll.u32 %s238_s4, 4  ;;  %s390_s19 = sshll.u32 %s386_s30, 4  ;;  %s389_s10 = int_to_ptr.vmem [resolvable:$true] %s388_s10  ;;  %s391_s19 = int_to_ptr.hbm [resolvable:$true] %s390_s19 }
  0xde   : > { %s356_s15 = scalar_lea.sflag [#allocation9], %s981_s6  ;;  %s773_s24 = sshra.s32 %s391_s19, 4  ;;  %s774_s24 = int_to_ptr.hbm [resolvable:$true] %s773_s24 }
  0xdf   : > { %v322_v55 = vadd.f32 %v321_v53, %v320_v51  ;;  %v343_v56 = vrot.slane %v342_v54, 4  ;;  %s775_s25 = scalar_lea.hbm %s774_s24, 2  ;;  %s779_s29 = scalar_lea.hbm %s1078_s3, 4 }
  0xe0   : > { %p776_p3 = scmp.ne.s32.totalorder %s774_s24, %s775_s25  ;;  %p780_p2 = scmp.lt.s32.totalorder %s774_s24, %s1078_s3 }
  0xe1   : > { %v323_v57 = vrot.slane %v322_v55, 2  ;;  %v344_v58 = vadd.f32 %v343_v56, %v342_v54  ;;  %p781_p1 = scmp.lt.s32.totalorder %s779_s29, %s775_s25 }
  0xe2   : > { %p777_p7 = pnand %p776_p3, %p958_p5 }
  0xe3   : > { %v324_v59 = vadd.f32 %v323_v57, %v322_v55  ;;  %v345_v60 = vrot.slane %v344_v58, 2  ;;  %p782_p4 = por %p781_p1, %p780_p2 }
  0xe4   : > { %p778_p9 = pneg %p777_p7 }
  0xe5   : > { %v325_v61 = vrot.slane %v324_v59, 1  ;;  %v346_v62 = vadd.f32 %v345_v60, %v344_v58 }
  0xe6   : > { %p783_p8 = pnand %p782_p4, %p778_p9 }
  0xe7   : > { %v326_v63 = vadd.f32 %v325_v61, %v324_v59  ;;  %v347_v0 = vrot.slane %v346_v62, 1 }
  0xe9   : > { %v348_v1 = vadd.f32 %v347_v0, %v346_v62  ;;  %327 = vst [vmem:[%s238_s4] sm:$0x1] %v326_v63 }
  0xeb   : > { %349 = vst [vmem:[%s238_s4 + $0x1] sm:$0x1] %v348_v1 }
  0xec   : > { %786 = shalt.err (!%p783_p8)
}
  0xed   : > { %596 = dma.vmem_to_hbm [thread:$0]  (%p958_p5), %s389_s10, 32, %s391_s19, %s356_s15  }
  0xee PF: > { %s402_s6 = sand.u32 1, %s829_s12   ;;  %p608_p10 = pnand %p523_p11, %p925_p6 }
  0xef   : > { %s403_s11 = scalar_lea.sflag [#allocation4], %s402_s6 }
  0xf0   : > { %p609_p12 = pneg %p608_p10 }
  0xf2   : > { %820 = dma.done.wait (%p609_p12), %s403_s11, 1024  }
  0xf3   : > { %822 = vsyncadd (%p609_p12), %s403_s11, 4294966272  ;;  %s413_s7 = scalar_lea.sflag [#allocation9], %s402_s6 }
  0xf4   : > { %824 = dma.done.wait (%p609_p12), %s413_s7, 32  }
  0xf5   : > { %826 = vsyncadd (%p609_p12), %s413_s7, 4294967264  ;;  %s24_s17 = sadd.s32 1, %s849_s17   ;;  %s1090_s12 = smov %s833_s13 }
  0xf6   : > { %p21_p13 = scmp.ge.s32.totalorder %s24_s17, 4   ;;  %s1091_s13 = smov %s837_s14 }
  0xf7   : > { %s1092_s14 = smov %s967_s18  ;;  %s1093_s15 = smov %s845_s16 }
  0xf8   : > { %s1094_s16 = smov %s1096_s5  ;;  %23 = sbr.rel (!%p21_p13) target bundleno = 11 (0xb), region = 94 }
  0xfd   :  { %419 = vsyncpa [#allocation3], 1 }
  0xfe   :  { %421 = vsyncpa [#allocation3 + $0x1], 1 }
  0xff   :  { %422 = vsyncpa [#allocation6], 1 }
 0x100   :  { %423 = vsyncpa [#allocation4], 1 }
 0x101   :  { %425 = vsyncpa [#allocation4 + $0x1], 1 }
 0x102   :  { %426 = vsyncpa [#allocation9], 1 }
 0x103   :  { %428 = vsyncpa [#allocation9 + $0x1], 1 }

</bundles_post_ra>
